<compile_context>
chip_gen: v7x
topology: tpu7x:2x2x1
jax: 0.10.0
libtpu: 0.0.40
codegen_flags: <defaults>
</compile_context>

<pallas_src>
import jax
import jax.numpy as jnp
from jax.experimental import pallas as pl
from jax.experimental.pallas import tpu as pltpu


def _round_up(x, m):
    return ((x + m - 1) // m) * m


def _round_down(x, m):
    return (x // m) * m


def _vmem_capacity_bytes():
    """Physical VMEM of the current chip, with a v7x-safe (64 MiB) fallback."""
    try:
        info = pltpu.get_tpu_info()
        cap = int(getattr(info, "vmem_capacity_bytes"))
        if cap > 0:
            return cap
    except Exception:
        pass
    return 64 << 20  # smallest across v5e/v6e/v7x -> always safe


def _conv1x1_kernel(x_ref, w_ref, b_ref, o_ref):
    # x_ref: (Cin, TILE)   -- spatial voxels on lanes (TILE % 128 == 0)
    # w_ref: (Cout, Cin)
    # b_ref: (Cout, 1)
    # o_ref: (Cout, TILE)  -- lane-dense output => unmasked stores (except
    #                         the ragged final block, which Pallas masks)
    acc = jnp.dot(w_ref[...], x_ref[...],
                  preferred_element_type=jnp.float32)        # (Cout, TILE)
    o_ref[...] = (acc + b_ref[...]).astype(o_ref.dtype)


def conv1x1_forward(x_ncdhw, weight, bias):
    """1x1x1 Conv3d.

    x_ncdhw: (N, Cin, D, H, W)
    weight:  (Cout, Cin, 1, 1, 1)  (PyTorch Conv3d layout)
    bias:    (Cout,)
    returns: (N, Cout, D, H, W), same dtype as x
    """
    N, Cin, D, H, W = x_ncdhw.shape
    Cout = weight.shape[0]
    S = D * H * W
    out_dtype = x_ncdhw.dtype

    # Flatten spatial onto the minor axis (free reshape in NCDHW layout).
    x2 = x_ncdhw.reshape(N, Cin, S)

    # Only pad to the next 128-lane multiple (usually a no-op); never to a
    # tile multiple — the ragged final block is handled by pl.cdiv + masked
    # stores inside the pipeline, avoiding an extra HBM pad/crop pass.
    S128 = _round_up(S, 128)
    if S128 != S:
        x2 = jnp.pad(x2, ((0, 0), (0, 0), (0, S128 - S)))

    # --- VMEM-budget-aware tile sizing -----------------------------------
    cap = _vmem_capacity_bytes()                # 128 MiB v5e/v6e, 64 MiB v7x
    vmem_limit = int(cap * 0.75)                # raised above default scoped
    io_budget = int(vmem_limit * 0.8)           # headroom for weights/misc
    in_bytes = jnp.dtype(x2.dtype).itemsize
    out_bytes = jnp.dtype(out_dtype).itemsize
    # Double-buffered input tile + output tile per lane of the spatial axis.
    bytes_per_lane = 2 * (Cin * in_bytes + Cout * out_bytes)
    tile = _round_down(io_budget // bytes_per_lane, 128)
    tile = max(128, min(tile, 64 * 1024, S128))  # 16K-64K lanes ~ roofline
    # TODO(synk): optionally stream x/out in bf16 (f32 accumulate stays) for
    # another ~2x HBM-bandwidth win if the surrounding model tolerates it.

    w2 = weight.reshape(Cout, Cin).astype(jnp.float32)
    b2 = bias.reshape(Cout, 1).astype(jnp.float32)

    grid = (N, pl.cdiv(S128, tile))

    out = pl.pallas_call(
        _conv1x1_kernel,
        out_shape=jax.ShapeDtypeStruct((N, Cout, S128), out_dtype),
        grid_spec=pltpu.PrefetchScalarGridSpec(
            num_scalar_prefetch=0,
            grid=grid,
            in_specs=[
                # leading size-1 batch dim squeezed -> kernel sees (Cin, tile)
                pl.BlockSpec((None, Cin, tile), lambda n, s: (n, 0, s)),
                pl.BlockSpec((Cout, Cin), lambda n, s: (0, 0)),
                pl.BlockSpec((Cout, 1), lambda n, s: (0, 0)),
            ],
            out_specs=pl.BlockSpec((None, Cout, tile), lambda n, s: (n, 0, s)),
        ),
        compiler_params=pltpu.CompilerParams(
            dimension_semantics=("parallel", "parallel"),
            vmem_limit_bytes=vmem_limit),
    )(x2, w2, b2)

    if S128 != S:
        out = out[:, :, :S]
    return out.reshape(N, Cout, D, H, W)


def _reference_forward(x_ncdhw, weight, bias):
    """Pure-JAX reference for validation."""
    w2 = weight.reshape(weight.shape[0], weight.shape[1])
    y = jnp.einsum('ncdhw,oc->nodhw', x_ncdhw, w2)
    return y + bias.reshape(1, -1, 1, 1, 1)


if __name__ == "__main__":
    # Small shapes consistent with the module: N=2, in_ch=4, out_ch=8, D=H=W=16.
    N, in_ch, out_ch = 2, 4, 8
    D = H = W = 16

    key = jax.random.PRNGKey(0)
    kx, kw, kb = jax.random.split(key, 3)
    x = jax.random.normal(kx, (N, in_ch, D, H, W), dtype=jnp.float32)
    weight = 0.1 * jax.random.normal(kw, (out_ch, in_ch, 1, 1, 1), jnp.float32)
    bias = 0.1 * jax.random.normal(kb, (out_ch,), jnp.float32)

    out = jax.jit(conv1x1_forward)(x, weight, bias)
    out = jax.block_until_ready(out)
    assert out.shape == (N, out_ch, D, H, W), out.shape

    ref = _reference_forward(x, weight, bias)
    assert jnp.allclose(out, ref, atol=2e-3, rtol=2e-3), \
        float(jnp.max(jnp.abs(out - ref)))

    print("KERNEL_OK")
</pallas_src>

<mosaic_0001>
module attributes {stable_mosaic.version = 11 : i64} {
  func.func @_conv1x1_kernel(%arg0: i32, %arg1: i32, %arg2: memref<1x4x4096xf32, #tpu.memory_space<vmem>>, %arg3: memref<8x4xf32, #tpu.memory_space<vmem>>, %arg4: memref<8x1xf32, #tpu.memory_space<vmem>>, %arg5: memref<1x8x4096xf32, #tpu.memory_space<vmem>>) attributes {dimension_semantics = [#tpu.dimension_semantics<parallel>, #tpu.dimension_semantics<parallel>], iteration_bounds = array<i64: 2, 1>, scalar_prefetch = 0 : i64, scratch_operands = 0 : i64, tpu.core_type = #tpu.core_type<tc>, window_params = [{transform_indices = @transform_0, window_bounds = array<i64: 1, 4, 4096>}, {pipeline_mode = #tpu.pipeline_mode<synchronous>, transform_indices = @transform_1, window_bounds = array<i64: 8, 4>}, {pipeline_mode = #tpu.pipeline_mode<synchronous>, transform_indices = @transform_2, window_bounds = array<i64: 8, 1>}, {transform_indices = @transform_3, window_bounds = array<i64: 1, 8, 4096>}]} {
    %c0 = arith.constant 0 : index
    %c0_0 = arith.constant 0 : index
    %0 = vector.load %arg3[%c0, %c0_0] : memref<8x4xf32, #tpu.memory_space<vmem>>, vector<8x4xf32>
    %c0_1 = arith.constant 0 : index
    %c0_2 = arith.constant 0 : index
    %c0_3 = arith.constant 0 : index
    %1 = vector.load %arg2[%c0_1, %c0_2, %c0_3] : memref<1x4x4096xf32, #tpu.memory_space<vmem>>, vector<1x4x4096xf32>
    %2 = vector.shape_cast %1 : vector<1x4x4096xf32> to vector<4x4096xf32>
    %cst = arith.constant dense<0.000000e+00> : vector<8x4096xf32>
    %3 = tpu.matmul %0, %2, %cst {dimension_numbers = #tpu.dot_dimension_numbers<[1], [0], [0], [1], [0, 0, 1, 1], [], []>} : vector<8x4xf32>, vector<4x4096xf32>, vector<8x4096xf32> -> vector<8x4096xf32>
    %c0_4 = arith.constant 0 : index
    %c0_5 = arith.constant 0 : index
    %4 = vector.load %arg4[%c0_4, %c0_5] : memref<8x1xf32, #tpu.memory_space<vmem>>, vector<8x1xf32>
    %5 = vector.broadcast %4 : vector<8x1xf32> to vector<8x4096xf32>
    %6 = arith.addf %3, %5 : vector<8x4096xf32>
    %c0_6 = arith.constant 0 : index
    %c0_7 = arith.constant 0 : index
    %c0_8 = arith.constant 0 : index
    %7 = vector.load %arg5[%c0_6, %c0_7, %c0_8] : memref<1x8x4096xf32, #tpu.memory_space<vmem>>, vector<1x8x4096xf32>
    %8 = vector.shape_cast %7 : vector<1x8x4096xf32> to vector<8x4096xf32>
    %9 = vector.shape_cast %6 : vector<8x4096xf32> to vector<1x8x4096xf32>
    tpu.vector_store %arg5[%c0_6, %c0_7, %c0_8], %9 {strides = array<i32>} : memref<1x8x4096xf32, #tpu.memory_space<vmem>>, vector<1x8x4096xf32>,
    return
  }
  func.func @transform_0(%arg0: i32, %arg1: i32) -> (i32, i32, i32) {
    %c0_i32 = arith.constant 0 : i32
    %c0_i32_0 = arith.constant 0 : i32
    return %arg0, %c0_i32, %arg1 : i32, i32, i32
  }
  func.func @transform_1(%arg0: i32, %arg1: i32) -> (i32, i32) {
    %c0_i32 = arith.constant 0 : i32
    %c0_i32_0 = arith.constant 0 : i32
    %c0_i32_1 = arith.constant 0 : i32
    return %c0_i32, %c0_i32_0 : i32, i32
  }
  func.func @transform_2(%arg0: i32, %arg1: i32) -> (i32, i32) {
    %c0_i32 = arith.constant 0 : i32
    %c0_i32_0 = arith.constant 0 : i32
    %c0_i32_1 = arith.constant 0 : i32
    return %c0_i32, %c0_i32_0 : i32, i32
  }
  func.func @transform_3(%arg0: i32, %arg1: i32) -> (i32, i32, i32) {
    %c0_i32 = arith.constant 0 : i32
    %c0_i32_0 = arith.constant 0 : i32
    return %arg0, %c0_i32, %arg1 : i32, i32, i32
  }
}

</mosaic_0001>

<bundles_post_ra>
// kernel: conv1x1_forward.1
= control target key start
LH: loop header
LB: loop body
LE: loop exit
PB: predicated region body
PF: predicated region fallthrough
CT: control target
= control target key end

     0   :  { %s1739_s12 = smov 0   ;;  %s1741_s13 = smov 0   ;;  %s1950_s0 = inlined_call_operand.vmem [shape: f32[2,4,4096], index: 0, kind: input, shape index: {}]   ;;  %s1951_s1 = inlined_call_operand.vmem [shape: f32[8,4], index: 1, kind: input, shape index: {}]   ;;  %s1952_s2 = inlined_call_operand.vmem [shape: f32[8,1], index: 2, kind: input, shape index: {}]   ;;  %s1953_s3 = inlined_call_operand.vmem [shape: f32[2,8,4096], index: 3, kind: output, shape index: {}]  }
   0x1   :  { %s1743_s14 = smov 0  }
   0x2 LB: > { %s25_s15 = sadd.s32 1, %s1711_s13  ;;  %p1593_p0 = scmp.ge.s32.totalorder %s1715_s14, 1  ;;  %s1715_s14 = sphi %s1743_s14, %s13_s14   ;;  %s1711_s13 = sphi %s1741_s13, %s1955_s13   ;;  %s1707_s12 = sphi %s1739_s12, %s1954_s12  }
   0x3   : > { %p27_p1 = scmp.ge.s32.totalorder %s25_s15, 2  ;;  %p158_p2 = scmp.lt.s32.totalorder %s1715_s14, 3 }
   0x5   : > { %s1957_s15 = smov (%p27_p1, %s25_s15), 0  ;;  %p159_p3 = pnand %p1593_p0, %p158_p2 }
   0x6   : > { %p191_p4 = scmp.lt.s32.totalorder (!%p159_p3), %s1707_s12, 1  ;;  %v1717_v0 = vmov (!%p159_p3), 0.0   ;;  %v227_v1 = vld [vmem:[%s1952_s2] sm:$0xff] (!%p159_p3)  ;;  %v1718_v2 = vmov (!%p159_p3), 0   ;;  %vm269_vm0 = vcmask (!%p159_p3), 1043456   ;;  %vm265_vm1 = vcmask (!%p159_p3), 31744  }
   0x7   : > { %162 = sbr.rel (%p159_p3) target bundleno = 266 (0x10a), region = 32  ;;  %398 = vmatprep.mubr.f32.mxu0 (!%p159_p3), %v1717_v0  ;;  %469 = vmatprep.mubr.f32.mxu1 (!%p159_p3), %v1717_v0  ;;  %v1777_v9 = vld [vmem:[%s1951_s1] sm:$0xff] (!%p159_p3) }
   0x8   : > { %1676 = vset.pattern.permute.xlu0 (!%p159_p3), %v1718_v2 }
   0x9   : > { %230 = vperm.xlu0 (!%p159_p3), %1676, %v227_v1  }
   0xe   : > { %s1959_s12 = smov (!%p191_p4, %s1707_s12), 1 }
   0xf   : > { %s1648_s18 = sshll.u32 %s1959_s12, 7  ;;  %s1649_s24 = sshll.u32 %s1959_s12, 8 }
  0x10   : > { %s1768_s21 = scalar_lea.vmem %s1950_s0, %s1648_s18  ;;  %s1875_s27 = scalar_lea.vmem %s1953_s3, %s1649_s24 }
  0x11   : > { %v211_v3 = vld [vmem:[%s1768_s21] sm:$0xff]  ;;  %v212_v4 = vld [vmem:[%s1768_s21 + $0x8] sm:$0xff]  ;;  %v213_v5 = vld [vmem:[%s1768_s21 + $0x10] sm:$0xff] }
  0x12   : > { %v249_v6 = vcombine.high %v211_v3, %v211_v3  ;;  %v250_v7 = vcombine.high %v212_v4, %v212_v4  ;;  %v214_v8 = vld [vmem:[%s1768_s21 + $0x18] sm:$0xff]  ;;  %v251_v10 = vcombine.high %v213_v5, %v213_v5  ;;  %v215_v12 = vld [vmem:[%s1768_s21 + $0x20] sm:$0xff]  ;;  %v216_v13 = vld [vmem:[%s1768_s21 + $0x28] sm:$0xff] }
  0x13   : > { %v252_v11 = vcombine.high %v214_v8, %v214_v8  ;;  %v253_v14 = vcombine.high %v215_v12, %v215_v12  ;;  %v254_v15 = vcombine.high %v216_v13, %v216_v13  ;;  %v217_v16 = vld [vmem:[%s1768_s21 + $0x30] sm:$0xff]  ;;  %v218_v17 = vld [vmem:[%s1768_s21 + $0x38] sm:$0xff]  ;;  %v219_v20 = vld [vmem:[%s1768_s21 + $0x40] sm:$0xff] }
  0x14   : > { %1598 = vmatprep.subr.msk.mxu0 %vm269_vm0, %v249_v6  ;;  %1601 = vmatprep.subr.msk.mxu1 %vm269_vm0, %v250_v7  ;;  %v255_v18 = vcombine.high %v217_v16, %v217_v16  ;;  %v256_v19 = vcombine.high %v218_v17, %v218_v17  ;;  %v220_v21 = vld [vmem:[%s1768_s21 + $0x48] sm:$0xff]  ;;  %v257_v22 = vcombine.high %v219_v20, %v219_v20  ;;  %v221_v24 = vld [vmem:[%s1768_s21 + $0x50] sm:$0xff]  ;;  %v222_v25 = vld [vmem:[%s1768_s21 + $0x58] sm:$0xff] }
  0x15   : > { %1599 = vmatpush1.msk.msra.mxu0 %vm269_vm0, %v211_v3  ;;  %1602 = vmatpush1.msk.msra.mxu1 %vm269_vm0, %v212_v4  ;;  %v258_v23 = vcombine.high %v220_v21, %v220_v21  ;;  %v259_v26 = vcombine.high %v221_v24, %v221_v24  ;;  %v260_v27 = vcombine.high %v222_v25, %v222_v25  ;;  %v223_v28 = vld [vmem:[%s1768_s21 + $0x60] sm:$0xff]  ;;  %v224_v29 = vld [vmem:[%s1768_s21 + $0x68] sm:$0xff]  ;;  %v225_v32 = vld [vmem:[%s1768_s21 + $0x70] sm:$0xff] }
  0x16   : > { %1600 = vmatmul.mubr.msk.f32.vlgmr.msra.gmra.mrb[0].mxu0 %vm265_vm1, %v1777_v9  ;;  %1603 = vmatmul.mubr.msk.f32.vlgmr.msra.gmra.mrb[0].mxu1 %vm265_vm1, %v1777_v9  ;;  %v261_v30 = vcombine.high %v223_v28, %v223_v28  ;;  %v262_v31 = vcombine.high %v224_v29, %v224_v29  ;;  %v226_v33 = vld [vmem:[%s1768_s21 + $0x78] sm:$0xff]  ;;  %v263_v34 = vcombine.high %v225_v32, %v225_v32 }
  0x17   : > { %1604 = vmatprep.subr.msk.mxu0 %vm269_vm0, %v251_v10  ;;  %1607 = vmatprep.subr.msk.mxu1 %vm269_vm0, %v252_v11  ;;  %v264_v35 = vcombine.high %v226_v33, %v226_v33 }
  0x18   : > { %1605 = vmatpush1.msk.msra.mxu0 %vm269_vm0, %v213_v5  ;;  %1608 = vmatpush1.msk.msra.mxu1 %vm269_vm0, %v214_v8 }
  0x19   : > { %540 = vmatprep.mubr.f32.mxu0 %v1717_v0  ;;  %611 = vmatprep.mubr.f32.mxu1 %v1717_v0 }
  0x1a   : > { %1606 = vmatmul.mubr.msk.f32.vlgmr.msra.gmra.mrb[2].mxu0 %vm265_vm1, %v1777_v9  ;;  %1609 = vmatmul.mubr.msk.f32.vlgmr.msra.gmra.mrb[2].mxu1 %vm265_vm1, %v1777_v9 }
  0x1b   : > { %1610 = vmatprep.subr.msk.mxu0 %vm269_vm0, %v253_v14  ;;  %1613 = vmatprep.subr.msk.mxu1 %vm269_vm0, %v254_v15 }
  0x1c   : > { %1611 = vmatpush1.msk.msra.mxu0 %vm269_vm0, %v215_v12  ;;  %1614 = vmatpush1.msk.msra.mxu1 %vm269_vm0, %v216_v13 }
  0x1d   : > { %682 = vmatprep.mubr.f32.mxu0 %v1717_v0  ;;  %753 = vmatprep.mubr.f32.mxu1 %v1717_v0 }
  0x1e   : > { %1612 = vmatmul.mubr.msk.f32.vlgmr.msra.gmra.mrb[4].mxu0 %vm265_vm1, %v1777_v9  ;;  %1615 = vmatmul.mubr.msk.f32.vlgmr.msra.gmra.mrb[4].mxu1 %vm265_vm1, %v1777_v9 }
  0x1f   : > { %1616 = vmatprep.subr.msk.mxu0 %vm269_vm0, %v255_v18  ;;  %1619 = vmatprep.subr.msk.mxu1 %vm269_vm0, %v256_v19 }
  0x20   : > { %1617 = vmatpush1.msk.msra.mxu0 %vm269_vm0, %v217_v16  ;;  %1620 = vmatpush1.msk.msra.mxu1 %vm269_vm0, %v218_v17 }
  0x21   : > { %824 = vmatprep.mubr.f32.mxu0 %v1717_v0  ;;  %895 = vmatprep.mubr.f32.mxu1 %v1717_v0 }
  0x22   : > { %1618 = vmatmul.mubr.msk.f32.vlgmr.msra.gmra.mrb[6].mxu0 %vm265_vm1, %v1777_v9  ;;  %1621 = vmatmul.mubr.msk.f32.vlgmr.msra.gmra.mrb[6].mxu1 %vm265_vm1, %v1777_v9 }
  0x23   : > { %1622 = vmatprep.subr.msk.mxu0 %vm269_vm0, %v257_v22  ;;  %1625 = vmatprep.subr.msk.mxu1 %vm269_vm0, %v258_v23 }
  0x24   : > { %1623 = vmatpush1.msk.msra.mxu0 %vm269_vm0, %v219_v20  ;;  %1626 = vmatpush1.msk.msra.mxu1 %vm269_vm0, %v220_v21 }
  0x25   : > { %966 = vmatprep.mubr.f32.mxu0 %v1717_v0  ;;  %1037 = vmatprep.mubr.f32.mxu1 %v1717_v0 }
  0x26   : > { %1624 = vmatmul.mubr.msk.f32.vlgmr.msra.gmra.mrb[8].mxu0 %vm265_vm1, %v1777_v9  ;;  %1627 = vmatmul.mubr.msk.f32.vlgmr.msra.gmra.mrb[8].mxu1 %vm265_vm1, %v1777_v9 }
  0x27   : > { %1628 = vmatprep.subr.msk.mxu0 %vm269_vm0, %v259_v26  ;;  %1631 = vmatprep.subr.msk.mxu1 %vm269_vm0, %v260_v27 }
  0x28   : > { %1629 = vmatpush1.msk.msra.mxu0 %vm269_vm0, %v221_v24  ;;  %1632 = vmatpush1.msk.msra.mxu1 %vm269_vm0, %v222_v25 }
  0x29   : > { %1108 = vmatprep.mubr.f32.mxu0 %v1717_v0  ;;  %1179 = vmatprep.mubr.f32.mxu1 %v1717_v0 }
  0x2a   : > { %1630 = vmatmul.mubr.msk.f32.vlgmr.msra.gmra.mrb[10].mxu0 %vm265_vm1, %v1777_v9  ;;  %1633 = vmatmul.mubr.msk.f32.vlgmr.msra.gmra.mrb[10].mxu1 %vm265_vm1, %v1777_v9 }
  0x2b   : > { %1634 = vmatprep.subr.msk.mxu0 %vm269_vm0, %v261_v30  ;;  %1637 = vmatprep.subr.msk.mxu1 %vm269_vm0, %v262_v31 }
  0x2c   : > { %1635 = vmatpush1.msk.msra.mxu0 %vm269_vm0, %v223_v28  ;;  %1638 = vmatpush1.msk.msra.mxu1 %vm269_vm0, %v224_v29 }
  0x2d   : > { %1250 = vmatprep.mubr.f32.mxu0 %v1717_v0  ;;  %1321 = vmatprep.mubr.f32.mxu1 %v1717_v0 }
  0x2e   : > { %1636 = vmatmul.mubr.msk.f32.vlgmr.msra.gmra.mrb[12].mxu0 %vm265_vm1, %v1777_v9  ;;  %1639 = vmatmul.mubr.msk.f32.vlgmr.msra.gmra.mrb[12].mxu1 %vm265_vm1, %v1777_v9 }
  0x2f   : > { %1640 = vmatprep.subr.msk.mxu0 %vm269_vm0, %v263_v34  ;;  %1643 = vmatprep.subr.msk.mxu1 %vm269_vm0, %v264_v35 }
  0x30   : > { %1641 = vmatpush1.msk.msra.mxu0 %vm269_vm0, %v225_v32  ;;  %1644 = vmatpush1.msk.msra.mxu1 %vm269_vm0, %v226_v33 }
  0x31   : > { %1392 = vmatprep.mubr.f32.mxu0 %v1717_v0  ;;  %1463 = vmatprep.mubr.f32.mxu1 %v1717_v0 }
  0x32   : > { %1642 = vmatmul.mubr.msk.f32.vlgmr.msra.gmra.mrb[14].mxu0 %vm265_vm1, %v1777_v9  ;;  %1645 = vmatmul.mubr.msk.f32.vlgmr.msra.gmra.mrb[14].mxu1 %vm265_vm1, %v1777_v9 }
  0x88   : > { %v1870_v36 = vpop.permute.xlu0 %230 }
  0xe9   : > { %v400_v37 = vpop.f32.mrb[0].mxu0  ;;  %v471_v38 = vpop.f32.mrb[0].mxu1 }
  0xea   : > { %v401_v39 = vadd.f32 %v400_v37, %v1870_v36  ;;  %v472_v40 = vadd.f32 %v471_v38, %v1870_v36  ;;  %v402_v41 = vpop.f32.mrb[1].mxu0  ;;  %v473_v42 = vpop.f32.mrb[1].mxu1 }
  0xeb   : > { %v403_v43 = vadd.f32 %v402_v41, %v1870_v36  ;;  %v474_v44 = vadd.f32 %v473_v42, %v1870_v36 }
  0xec   : > { %1470 = vst [vmem:[%s1875_s27] sm:$0xff] %v401_v39  ;;  %1472 = vst [vmem:[%s1875_s27 + $0x10] sm:$0xff] %v472_v40 }
  0xed   : > { %1471 = vst [vmem:[%s1875_s27 + $0x8] sm:$0xff] %v403_v43  ;;  %1473 = vst [vmem:[%s1875_s27 + $0x18] sm:$0xff] %v474_v44  ;;  %v542_v45 = vpop.f32.mrb[2].mxu0  ;;  %v613_v46 = vpop.f32.mrb[2].mxu1 }
  0xee   : > { %v543_v47 = vadd.f32 %v542_v45, %v1870_v36  ;;  %v614_v48 = vadd.f32 %v613_v46, %v1870_v36  ;;  %v544_v49 = vpop.f32.mrb[3].mxu0  ;;  %v615_v50 = vpop.f32.mrb[3].mxu1 }
  0xef   : > { %v545_v51 = vadd.f32 %v544_v49, %v1870_v36  ;;  %v616_v52 = vadd.f32 %v615_v50, %v1870_v36 }
  0xf0   : > { %1474 = vst [vmem:[%s1875_s27 + $0x20] sm:$0xff] %v543_v47  ;;  %1476 = vst [vmem:[%s1875_s27 + $0x30] sm:$0xff] %v614_v48 }
  0xf1   : > { %1475 = vst [vmem:[%s1875_s27 + $0x28] sm:$0xff] %v545_v51  ;;  %1477 = vst [vmem:[%s1875_s27 + $0x38] sm:$0xff] %v616_v52  ;;  %v684_v53 = vpop.f32.mrb[4].mxu0  ;;  %v755_v54 = vpop.f32.mrb[4].mxu1 }
  0xf2   : > { %v685_v55 = vadd.f32 %v684_v53, %v1870_v36  ;;  %v756_v56 = vadd.f32 %v755_v54, %v1870_v36  ;;  %v686_v57 = vpop.f32.mrb[5].mxu0  ;;  %v757_v58 = vpop.f32.mrb[5].mxu1 }
  0xf3   : > { %v687_v59 = vadd.f32 %v686_v57, %v1870_v36  ;;  %v758_v60 = vadd.f32 %v757_v58, %v1870_v36 }
  0xf4   : > { %1478 = vst [vmem:[%s1875_s27 + $0x40] sm:$0xff] %v685_v55  ;;  %1480 = vst [vmem:[%s1875_s27 + $0x50] sm:$0xff] %v756_v56 }
  0xf5   : > { %1479 = vst [vmem:[%s1875_s27 + $0x48] sm:$0xff] %v687_v59  ;;  %1481 = vst [vmem:[%s1875_s27 + $0x58] sm:$0xff] %v758_v60  ;;  %v826_v61 = vpop.f32.mrb[6].mxu0  ;;  %v897_v62 = vpop.f32.mrb[6].mxu1 }
  0xf6   : > { %v827_v63 = vadd.f32 %v826_v61, %v1870_v36  ;;  %v898_v0 = vadd.f32 %v897_v62, %v1870_v36  ;;  %v828_v1 = vpop.f32.mrb[7].mxu0  ;;  %v899_v2 = vpop.f32.mrb[7].mxu1 }
  0xf7   : > { %v829_v3 = vadd.f32 %v828_v1, %v1870_v36  ;;  %v900_v4 = vadd.f32 %v899_v2, %v1870_v36 }
  0xf8   : > { %1482 = vst [vmem:[%s1875_s27 + $0x60] sm:$0xff] %v827_v63  ;;  %1484 = vst [vmem:[%s1875_s27 + $0x70] sm:$0xff] %v898_v0 }
  0xf9   : > { %1483 = vst [vmem:[%s1875_s27 + $0x68] sm:$0xff] %v829_v3  ;;  %1485 = vst [vmem:[%s1875_s27 + $0x78] sm:$0xff] %v900_v4  ;;  %v968_v5 = vpop.f32.mrb[8].mxu0  ;;  %v1039_v6 = vpop.f32.mrb[8].mxu1 }
  0xfa   : > { %v969_v7 = vadd.f32 %v968_v5, %v1870_v36  ;;  %v1040_v8 = vadd.f32 %v1039_v6, %v1870_v36  ;;  %v970_v9 = vpop.f32.mrb[9].mxu0  ;;  %v1041_v10 = vpop.f32.mrb[9].mxu1 }
  0xfb   : > { %v971_v11 = vadd.f32 %v970_v9, %v1870_v36  ;;  %v1042_v12 = vadd.f32 %v1041_v10, %v1870_v36 }
  0xfc   : > { %1486 = vst [vmem:[%s1875_s27 + $0x80] sm:$0xff] %v969_v7  ;;  %1488 = vst [vmem:[%s1875_s27 + $0x90] sm:$0xff] %v1040_v8 }
  0xfd   : > { %1487 = vst [vmem:[%s1875_s27 + $0x88] sm:$0xff] %v971_v11  ;;  %1489 = vst [vmem:[%s1875_s27 + $0x98] sm:$0xff] %v1042_v12  ;;  %v1110_v13 = vpop.f32.mrb[10].mxu0  ;;  %v1181_v14 = vpop.f32.mrb[10].mxu1 }
  0xfe   : > { %v1111_v15 = vadd.f32 %v1110_v13, %v1870_v36  ;;  %v1182_v16 = vadd.f32 %v1181_v14, %v1870_v36  ;;  %v1112_v17 = vpop.f32.mrb[11].mxu0  ;;  %v1183_v18 = vpop.f32.mrb[11].mxu1 }
  0xff   : > { %v1113_v19 = vadd.f32 %v1112_v17, %v1870_v36  ;;  %v1184_v20 = vadd.f32 %v1183_v18, %v1870_v36 }
 0x100   : > { %1490 = vst [vmem:[%s1875_s27 + $0xa0] sm:$0xff] %v1111_v15  ;;  %1492 = vst [vmem:[%s1875_s27 + $0xb0] sm:$0xff] %v1182_v16 }
 0x101   : > { %1491 = vst [vmem:[%s1875_s27 + $0xa8] sm:$0xff] %v1113_v19  ;;  %1493 = vst [vmem:[%s1875_s27 + $0xb8] sm:$0xff] %v1184_v20  ;;  %v1252_v21 = vpop.f32.mrb[12].mxu0  ;;  %v1323_v22 = vpop.f32.mrb[12].mxu1 }
 0x102   : > { %v1253_v23 = vadd.f32 %v1252_v21, %v1870_v36  ;;  %v1324_v24 = vadd.f32 %v1323_v22, %v1870_v36  ;;  %v1254_v25 = vpop.f32.mrb[13].mxu0  ;;  %v1325_v26 = vpop.f32.mrb[13].mxu1 }
 0x103   : > { %v1255_v27 = vadd.f32 %v1254_v25, %v1870_v36  ;;  %v1326_v28 = vadd.f32 %v1325_v26, %v1870_v36 }
 0x104   : > { %1494 = vst [vmem:[%s1875_s27 + $0xc0] sm:$0xff] %v1253_v23  ;;  %1496 = vst [vmem:[%s1875_s27 + $0xd0] sm:$0xff] %v1324_v24 }
 0x105   : > { %1495 = vst [vmem:[%s1875_s27 + $0xc8] sm:$0xff] %v1255_v27  ;;  %1497 = vst [vmem:[%s1875_s27 + $0xd8] sm:$0xff] %v1326_v28  ;;  %v1394_v29 = vpop.f32.mrb[14].mxu0  ;;  %v1465_v30 = vpop.f32.mrb[14].mxu1 }
 0x106   : > { %v1395_v31 = vadd.f32 %v1394_v29, %v1870_v36  ;;  %v1466_v32 = vadd.f32 %v1465_v30, %v1870_v36  ;;  %v1396_v33 = vpop.f32.mrb[15].mxu0  ;;  %v1467_v34 = vpop.f32.mrb[15].mxu1 }
 0x107   : > { %v1397_v35 = vadd.f32 %v1396_v33, %v1870_v36  ;;  %v1468_v37 = vadd.f32 %v1467_v34, %v1870_v36 }
 0x108   : > { %1498 = vst [vmem:[%s1875_s27 + $0xe0] sm:$0xff] %v1395_v31  ;;  %1500 = vst [vmem:[%s1875_s27 + $0xf0] sm:$0xff] %v1466_v32 }
 0x109   : > { %1499 = vst [vmem:[%s1875_s27 + $0xe8] sm:$0xff] %v1397_v35  ;;  %1501 = vst [vmem:[%s1875_s27 + $0xf8] sm:$0xff] %v1468_v37 }
 0x10a PF: > { %s13_s14 = sadd.s32 1, %s1715_s14   ;;  %s1954_s12 = smov %s1711_s13 }
 0x10b   : > { %p10_p5 = scmp.ge.s32.totalorder %s13_s14, 4   ;;  %s1955_s13 = smov %s1957_s15 }
 0x10d   :  { %12 = sbr.rel (!%p10_p5) target bundleno = 2 (0x2), region = 62 }

</bundles_post_ra>
